<compile_context>
chip_gen: v6e
topology: v6e:2x2x1
jax: 0.10.0
libtpu: 0.0.40
codegen_flags: <defaults>
</compile_context>

<pallas_src>
import functools

import jax
import jax.numpy as jnp
from jax.experimental import pallas as pl
from jax.experimental.pallas import tpu as pltpu


def _round_up(v, m):
    return (v + m - 1) // m * m


def _cdiv(a, b):
    return (a + b - 1) // b


def _conv1d_kernel(x_ref, halo_ref, w_ref, o_ref, row_ref, xcol_ref, *,
                   ks, ni_pad, l_tile):
    # x_ref   : (ni_pad, l_tile)        main input window of this L tile
    # halo_ref: (ni_pad, 128)           right halo (covers the ks-1 tail taps)
    # w_ref   : (nf_pad, ks*ni_pad)     im2col-ordered weight (constant block
    #                                   index -> DMA'd once, VMEM resident)
    # o_ref   : (nf_pad, l_tile)        lane-dense output tile (l_tile % 128 == 0)
    # row_ref : (ni_pad, l_tile + 128)  VMEM scratch: contiguous main|halo row
    # xcol_ref: (ks*ni_pad, l_tile)     VMEM scratch: im2col RHS for the MXU

    # Stage the contiguous row once per tile; both stores are 128-lane aligned
    # (l_tile is a multiple of 128), so they are plain unmasked vst's.
    row_ref[:, :l_tile] = x_ref[...]
    row_ref[:, l_tile:] = halo_ref[...]

    # Build the im2col RHS in VMEM: tap k of output column j is row[:, j + k].
    # Static unrolled loop; each tap is a ref-level load + 8-aligned sublane
    # store, keeping vreg pressure bounded regardless of ni / l_tile.
    for k in range(ks):
        xcol_ref[k * ni_pad:(k + 1) * ni_pad, :] = row_ref[:, pl.ds(k, l_tile)]

    # Single MXU contraction per tile: (nf_pad, K) @ (K, l_tile), K = ks*ni_pad.
    o_ref[...] = jnp.dot(
        w_ref[...], xcol_ref[...], preferred_element_type=jnp.float32
    ).astype(o_ref.dtype)


def conv1d_new_padding(x, weight, *, stride=1, l_tile_max=2048, use_bf16=False):
    """x: (N, ni, L); weight: (nf, ni, ks); returns (N, nf, L).

    Equivalent to ConstantPad1d(((ks-1)//2, ks//2), 0) followed by
    Conv1d(ni, nf, ks, stride=1, bias=False).
    """
    assert stride == 1, "reference module is used with stride=1"
    n, ni, length = x.shape
    nf, ni_w, ks = weight.shape
    assert ni == ni_w
    assert ks - 1 <= 128, "halo window is a single 128-lane slab"

    pad_l = (ks - 1) // 2

    # Channel / filter counts rounded to sublane multiples -> every tap slice,
    # the im2col stack and the output stores stay (8,128)-tile aligned.
    ni_pad = _round_up(ni, 8)
    nf_pad = _round_up(nf, 8)

    compute_dtype = jnp.bfloat16 if use_bf16 else x.dtype
    item = jnp.dtype(compute_dtype).itemsize

    def _footprint_bytes(lt):
        # Pipeline operands are double-buffered by Pallas (counted once here),
        # VMEM scratch buffers are single.
        return ((2 * ni_pad * lt                   # main x window
                 + 2 * ni_pad * 128                # halo window
                 + 2 * nf_pad * ks * ni_pad        # im2col weight
                 + ni_pad * (lt + 128)             # row scratch
                 + ks * ni_pad * lt) * item        # im2col scratch
                + 2 * nf_pad * lt * 4)             # f32 output tile

    # Per-generation VMEM cap (v5e/v6e: 128 MiB, v7x: 64 MiB) with headroom
    # left for Mosaic internal scratch / spill.
    try:
        vmem_cap = int(pltpu.get_tpu_info().vmem_capacity_bytes)
    except Exception:  # pragma: no cover - conservative fallback
        vmem_cap = 64 * 1024 * 1024
    usable = int(vmem_cap * 0.8)

    # Fat lane-dense L tiles (amortize per-grid-step overhead); shrink only if
    # the footprint would not fit the per-generation budget.
    l_tile = min(_round_up(length, 128), l_tile_max)
    while l_tile > 128 and int(_footprint_bytes(l_tile) * 1.25) > usable:
        l_tile = _round_up(l_tile // 2, 128)
    num_lt = _cdiv(length, l_tile)
    if n * num_lt < 2 and l_tile > 128:
        # v7x has 2 TensorCores sharded over "parallel" axes: keep >= 2 points.
        l_tile = max(128, _round_up(_cdiv(length, 2), 128))
        num_lt = _cdiv(length, l_tile)
    l_out_pad = num_lt * l_tile
    lt_blocks = l_tile // 128

    # Padded row length: enough for every tile's main window plus one 128-wide
    # halo block after the last tile (also covers the conv right halo).
    lp = l_out_pad + 128

    # One fused pad: conv left zero-halo + channel rounding + right halo/lane
    # rounding.  TODO(synk): generate the zero halo in-kernel to remove this
    # extra HBM pass over x.
    x_pad = jnp.pad(
        x, ((0, 0), (0, ni_pad - ni), (pad_l, lp - pad_l - length))
    ).astype(compute_dtype)

    # Weight -> (nf_pad, ks * ni_pad): column index = k * ni_pad + c, matching
    # the sublane order of the in-kernel im2col stack.  Padded rows/cols are 0.
    w2 = jnp.pad(weight, ((0, nf_pad - nf), (0, ni_pad - ni), (0, 0)))
    w2 = jnp.transpose(w2, (0, 2, 1)).reshape(nf_pad, ks * ni_pad)
    w2 = w2.astype(compute_dtype)

    kernel = functools.partial(
        _conv1d_kernel, ks=ks, ni_pad=ni_pad, l_tile=l_tile)

    vmem_limit = int(min(
        max(_footprint_bytes(l_tile) * 1.25, 16 * 1024 * 1024), usable))

    out_pad = pl.pallas_call(
        kernel,
        out_shape=jax.ShapeDtypeStruct((n, nf_pad, l_out_pad), x.dtype),
        grid_spec=pltpu.PrefetchScalarGridSpec(
            num_scalar_prefetch=0,
            grid=(n, num_lt),
            in_specs=[
                # Main window: element offset lt * l_tile (Blocked indexing).
                pl.BlockSpec((None, ni_pad, l_tile), lambda b, lt: (b, 0, lt)),
                # Right halo: the 128 columns immediately after the main
                # window, i.e. 128-block index (lt + 1) * (l_tile // 128).
                pl.BlockSpec((None, ni_pad, 128),
                             lambda b, lt: (b, 0, (lt + 1) * lt_blocks)),
                # Reshaped weight, loaded once and reused for the whole grid.
                pl.BlockSpec((nf_pad, ks * ni_pad), lambda b, lt: (0, 0)),
            ],
            out_specs=pl.BlockSpec((None, nf_pad, l_tile),
                                   lambda b, lt: (b, 0, lt)),
            scratch_shapes=[
                pltpu.VMEM((ni_pad, l_tile + 128), compute_dtype),   # row
                pltpu.VMEM((ks * ni_pad, l_tile), compute_dtype),    # im2col
            ],
        ),
        compiler_params=pltpu.CompilerParams(
            dimension_semantics=("parallel", "parallel"),
            vmem_limit_bytes=vmem_limit,
        ),
    )(x_pad, x_pad, w2)

    if nf_pad == nf and l_out_pad == length:
        return out_pad
    return out_pad[:, :nf, :length]


def _reference(x, weight):
    # pure-JAX reference for the correctness check
    ks = weight.shape[-1]
    pad_l, pad_r = (ks - 1) // 2, ks // 2
    return jax.lax.conv_general_dilated(
        x, weight,
        window_strides=(1,),
        padding=[(pad_l, pad_r)],
        dimension_numbers=("NCH", "OIH", "NCH"),
    )


if __name__ == "__main__":
    key = jax.random.PRNGKey(0)
    k_x, k_w = jax.random.split(key)

    # small shapes consistent with the module: Conv1d_new_padding(ni=4, nf=8, ks=5)
    batch, ni, nf, ks, length = 2, 4, 8, 5, 16

    x = jax.random.normal(k_x, (batch, ni, length), dtype=jnp.float32)

    # deterministic Conv1d-style weight init: U(-b, b), b = 1/sqrt(ni*ks)
    bound = 1.0 / jnp.sqrt(jnp.array(ni * ks, jnp.float32))
    weight = jax.random.uniform(
        k_w, (nf, ni, ks), dtype=jnp.float32, minval=-bound, maxval=bound
    )

    out = conv1d_new_padding(x, weight)
    out = jax.block_until_ready(out)

    ref = jax.block_until_ready(_reference(x, weight))
    assert out.shape == (batch, nf, length)
    assert jnp.allclose(out, ref, atol=1e-4, rtol=1e-4)

    print("KERNEL_OK")
</pallas_src>

<mosaic_0001>
module attributes {stable_mosaic.version = 11 : i64} {
  func.func @_conv1d_kernel(%arg0: i32, %arg1: i32, %arg2: memref<1x8x128xf32, #tpu.memory_space<vmem>>, %arg3: memref<1x8x128xf32, #tpu.memory_space<vmem>>, %arg4: memref<8x40xf32, #tpu.memory_space<vmem>>, %arg5: memref<1x8x128xf32, #tpu.memory_space<vmem>>, %arg6: memref<8x256xf32, #tpu.memory_space<vmem>>, %arg7: memref<40x128xf32, #tpu.memory_space<vmem>>) attributes {dimension_semantics = [#tpu.dimension_semantics<parallel>, #tpu.dimension_semantics<parallel>], iteration_bounds = array<i64: 2, 1>, scalar_prefetch = 0 : i64, scratch_operands = 2 : i64, tpu.core_type = #tpu.core_type<tc>, window_params = [{transform_indices = @transform_0, window_bounds = array<i64: 1, 8, 128>}, {transform_indices = @transform_1, window_bounds = array<i64: 1, 8, 128>}, {pipeline_mode = #tpu.pipeline_mode<synchronous>, transform_indices = @transform_2, window_bounds = array<i64: 8, 40>}, {transform_indices = @transform_3, window_bounds = array<i64: 1, 8, 128>}]} {
    %c0 = arith.constant 0 : index
    %c0_0 = arith.constant 0 : index
    %c0_1 = arith.constant 0 : index
    %0 = vector.load %arg2[%c0, %c0_0, %c0_1] : memref<1x8x128xf32, #tpu.memory_space<vmem>>, vector<1x8x128xf32>
    %1 = vector.shape_cast %0 : vector<1x8x128xf32> to vector<8x128xf32>
    %c0_2 = arith.constant 0 : index
    %c0_3 = arith.constant 0 : index
    %2 = vector.load %arg6[%c0_2, %c0_3] : memref<8x256xf32, #tpu.memory_space<vmem>>, vector<8x128xf32>
    tpu.vector_store %arg6[%c0_2, %c0_3], %1 {strides = array<i32>} : memref<8x256xf32, #tpu.memory_space<vmem>>, vector<8x128xf32>,
    %c0_4 = arith.constant 0 : index
    %c0_5 = arith.constant 0 : index
    %c0_6 = arith.constant 0 : index
    %3 = vector.load %arg3[%c0_4, %c0_5, %c0_6] : memref<1x8x128xf32, #tpu.memory_space<vmem>>, vector<1x8x128xf32>
    %4 = vector.shape_cast %3 : vector<1x8x128xf32> to vector<8x128xf32>
    %c0_7 = arith.constant 0 : index
    %c128 = arith.constant 128 : index
    %5 = vector.load %arg6[%c0_7, %c128] : memref<8x256xf32, #tpu.memory_space<vmem>>, vector<8x128xf32>
    tpu.vector_store %arg6[%c0_7, %c128], %4 {strides = array<i32>} : memref<8x256xf32, #tpu.memory_space<vmem>>, vector<8x128xf32>,
    %c0_8 = arith.constant 0 : index
    %c0_9 = arith.constant 0 : index
    %6 = vector.load %arg6[%c0_8, %c0_9] : memref<8x256xf32, #tpu.memory_space<vmem>>, vector<8x128xf32>
    %c0_10 = arith.constant 0 : index
    %c0_11 = arith.constant 0 : index
    %7 = vector.load %arg7[%c0_10, %c0_11] : memref<40x128xf32, #tpu.memory_space<vmem>>, vector<8x128xf32>
    tpu.vector_store %arg7[%c0_10, %c0_11], %6 {strides = array<i32>} : memref<40x128xf32, #tpu.memory_space<vmem>>, vector<8x128xf32>,
    %c0_12 = arith.constant 0 : index
    %c1 = arith.constant 1 : index
    %8 = vector.load %arg6[%c0_12, %c1] : memref<8x256xf32, #tpu.memory_space<vmem>>, vector<8x128xf32>
    %c8 = arith.constant 8 : index
    %c0_13 = arith.constant 0 : index
    %9 = vector.load %arg7[%c8, %c0_13] : memref<40x128xf32, #tpu.memory_space<vmem>>, vector<8x128xf32>
    tpu.vector_store %arg7[%c8, %c0_13], %8 {strides = array<i32>} : memref<40x128xf32, #tpu.memory_space<vmem>>, vector<8x128xf32>,
    %c0_14 = arith.constant 0 : index
    %c2 = arith.constant 2 : index
    %10 = vector.load %arg6[%c0_14, %c2] : memref<8x256xf32, #tpu.memory_space<vmem>>, vector<8x128xf32>
    %c16 = arith.constant 16 : index
    %c0_15 = arith.constant 0 : index
    %11 = vector.load %arg7[%c16, %c0_15] : memref<40x128xf32, #tpu.memory_space<vmem>>, vector<8x128xf32>
    tpu.vector_store %arg7[%c16, %c0_15], %10 {strides = array<i32>} : memref<40x128xf32, #tpu.memory_space<vmem>>, vector<8x128xf32>,
    %c0_16 = arith.constant 0 : index
    %c3 = arith.constant 3 : index
    %12 = vector.load %arg6[%c0_16, %c3] : memref<8x256xf32, #tpu.memory_space<vmem>>, vector<8x128xf32>
    %c24 = arith.constant 24 : index
    %c0_17 = arith.constant 0 : index
    %13 = vector.load %arg7[%c24, %c0_17] : memref<40x128xf32, #tpu.memory_space<vmem>>, vector<8x128xf32>
    tpu.vector_store %arg7[%c24, %c0_17], %12 {strides = array<i32>} : memref<40x128xf32, #tpu.memory_space<vmem>>, vector<8x128xf32>,
    %c0_18 = arith.constant 0 : index
    %c4 = arith.constant 4 : index
    %14 = vector.load %arg6[%c0_18, %c4] : memref<8x256xf32, #tpu.memory_space<vmem>>, vector<8x128xf32>
    %c32 = arith.constant 32 : index
    %c0_19 = arith.constant 0 : index
    %15 = vector.load %arg7[%c32, %c0_19] : memref<40x128xf32, #tpu.memory_space<vmem>>, vector<8x128xf32>
    tpu.vector_store %arg7[%c32, %c0_19], %14 {strides = array<i32>} : memref<40x128xf32, #tpu.memory_space<vmem>>, vector<8x128xf32>,
    %c0_20 = arith.constant 0 : index
    %c0_21 = arith.constant 0 : index
    %16 = vector.load %arg4[%c0_20, %c0_21] : memref<8x40xf32, #tpu.memory_space<vmem>>, vector<8x40xf32>
    %c0_22 = arith.constant 0 : index
    %c0_23 = arith.constant 0 : index
    %17 = vector.load %arg7[%c0_22, %c0_23] : memref<40x128xf32, #tpu.memory_space<vmem>>, vector<40x128xf32>
    %cst = arith.constant dense<0.000000e+00> : vector<8x128xf32>
    %18 = tpu.matmul %16, %17, %cst {dimension_numbers = #tpu.dot_dimension_numbers<[1], [0], [0], [1], [0, 0, 1, 1], [], []>} : vector<8x40xf32>, vector<40x128xf32>, vector<8x128xf32> -> vector<8x128xf32>
    %c0_24 = arith.constant 0 : index
    %c0_25 = arith.constant 0 : index
    %c0_26 = arith.constant 0 : index
    %19 = vector.load %arg5[%c0_24, %c0_25, %c0_26] : memref<1x8x128xf32, #tpu.memory_space<vmem>>, vector<1x8x128xf32>
    %20 = vector.shape_cast %19 : vector<1x8x128xf32> to vector<8x128xf32>
    %21 = vector.shape_cast %18 : vector<8x128xf32> to vector<1x8x128xf32>
    tpu.vector_store %arg5[%c0_24, %c0_25, %c0_26], %21 {strides = array<i32>} : memref<1x8x128xf32, #tpu.memory_space<vmem>>, vector<1x8x128xf32>,
    return
  }
  func.func @transform_0(%arg0: i32, %arg1: i32) -> (i32, i32, i32) {
    %c0_i32 = arith.constant 0 : i32
    %c0_i32_0 = arith.constant 0 : i32
    return %arg0, %c0_i32, %arg1 : i32, i32, i32
  }
  func.func @transform_1(%arg0: i32, %arg1: i32) -> (i32, i32, i32) {
    %c1_i32 = arith.constant 1 : i32
    %0 = arith.addi %arg1, %c1_i32 : i32
    %c1_i32_0 = arith.constant 1 : i32
    %1 = arith.muli %0, %c1_i32_0 : i32
    %c0_i32 = arith.constant 0 : i32
    %c0_i32_1 = arith.constant 0 : i32
    return %arg0, %c0_i32, %1 : i32, i32, i32
  }
  func.func @transform_2(%arg0: i32, %arg1: i32) -> (i32, i32) {
    %c0_i32 = arith.constant 0 : i32
    %c0_i32_0 = arith.constant 0 : i32
    %c0_i32_1 = arith.constant 0 : i32
    return %c0_i32, %c0_i32_0 : i32, i32
  }
  func.func @transform_3(%arg0: i32, %arg1: i32) -> (i32, i32, i32) {
    %c0_i32 = arith.constant 0 : i32
    %c0_i32_0 = arith.constant 0 : i32
    return %arg0, %c0_i32, %arg1 : i32, i32, i32
  }
}

</mosaic_0001>

<bundles_post_ra>
// kernel: tpu_custom_call.1
= control target key start
LH: loop header
LB: loop body
LE: loop exit
PB: predicated region body
PF: predicated region fallthrough
CT: control target
= control target key end

     0   :  { %s1050_s0 = inlined_call_operand.hbm [shape: f32[2,8,256], index: 0, kind: input, shape index: {}]   ;;  %s1051_s1 = inlined_call_operand.hbm [shape: f32[2,8,256], index: 1, kind: input, shape index: {}]   ;;  %s1052_s2 = inlined_call_operand.hbm [shape: f32[8,40], index: 2, kind: input, shape index: {}]   ;;  %s1053_s3 = inlined_call_operand.hbm [shape: f32[2,8,128], index: 3, kind: output, shape index: {}]  }
   0x1   :  { %1054 = sst [smem:[#allocation15_spill]] %s1050_s0 }
   0x2   :  { %1055 = sst [smem:[#allocation16_spill]] %s1051_s1 }
   0x3   :  { %8 = vsyncpa [#allocation5], 0 }
   0x4   :  { %10 = vsyncpa [#allocation5 + $0x1], 0 }
   0x5   :  { %11 = vsyncpa [#allocation8], 0 }
   0x6   :  { %13 = vsyncpa [#allocation8 + $0x1], 0 }
   0x7   :  { %14 = vsyncpa [#allocation6], 0 }
   0x8   :  { %16 = vsyncpa [#allocation6 + $0x1], 0  ;;  %s856_s12 = smov 0   ;;  %s858_s13 = smov 0  }
   0x9   :  { %s860_s14 = smov 0   ;;  %s862_s15 = smov 0  }
   0xa   :  { %s864_s16 = smov 0   ;;  %s866_s17 = smov 0  }
   0xb LB: > { %s887_s18 = sadd.s32 4294967295, %s824_s17   ;;  %s528_s19 = sadd.s32 4294967294, %s824_s17   ;;  %s824_s17 = sphi %s866_s17, %s22_s17   ;;  %s820_s16 = sphi %s864_s16, %s1071_s16   ;;  %s816_s15 = sphi %s862_s15, %s1070_s15   ;;  %s812_s14 = sphi %s860_s14, %s1069_s14   ;;  %s808_s13 = sphi %s858_s13, %s1068_s13   ;;  %s804_s12 = sphi %s856_s12, %s1067_s12  }
   0xc   : > { %p56_p0 = scmp.ne.s32.totalorder %s808_s13, %s804_s12  ;;  %p57_p1 = scmp.eq.s32.totalorder %s887_s18, 0 }
   0xd   : > { %p139_p3 = scmp.eq.s32.totalorder %s528_s19, 1  ;;  %p529_p5 = scmp.ge.s32.totalorder %s824_s17, 1 }
   0xe   : > { %p896_p4 = por %p57_p1, %p56_p0  ;;  %p146_p7 = scmp.lt.s32.totalorder %s824_s17, 3 }
   0xf   : > { %p901_p6 = por %p139_p3, %p56_p0  ;;  %s826_s23 = smov [#allocation9]  }
  0x10   : > { %p906_p8 = pnand %p529_p5, %p146_p7  ;;  %s159_s24 = sshll.u32 %s826_s23, 4  ;;  %s160_s24 = int_to_ptr.vmem [resolvable:$true] %s159_s24 }
  0x11   : > { %s1057_s21 = scalar_select %p901_p6, 1, 0 }
  0x12   : > { %p579_p10 = pneg %p906_p8  ;;  %s34_s26 = sadd.s32 1, %s820_s16 }
  0x13   : > { %s43_s27 = sadd.s32 1, %s812_s14  ;;  %p36_p12 = scmp.ge.s32.totalorder %s34_s26, 2 }
  0x14   : > { %p915_p11 = pnand %p579_p10, %p57_p1  ;;  %s664_s28 = scalar_lea.vmem %s160_s24, 128 }
  0x15   : > { %p665_p0 = scmp.ne.s32.totalorder %s160_s24, %s664_s28  ;;  %p672_p7 = scmp.lt.s32.totalorder %s160_s24, %s160_s24 }
  0x16   : > { %p655_p13 = pneg %p915_p11  ;;  %p673_p2 = scmp.lt.s32.totalorder %s664_s28, %s664_s28 }
  0x18   : > { %p667_p3 = pnand %p665_p0, %p655_p13  ;;  %p674_p9 = por %p673_p2, %p672_p7 }
  0x1a   : > { %p668_p5 = pneg %p667_p3 }
  0x1c   : > { %p675_p6 = pnand %p674_p9, %p668_p5 }
  0x1e   : > { %678 = shalt.err (!%p675_p6)
}
  0x1f   : > { %582 = dma.hbm_to_vmem [thread:$0]  (!%p915_p11), %s1052_s2, 128, %s160_s24, [#allocation8]  }
  0x20   : > { %s1073_s26 = smov (%p36_p12, %s34_s26), 0  ;;  %p50_p2 = scmp.ne.s32.totalorder %s812_s14, %s808_s13 }
  0x21   : > { %p51_p6 = scmp.eq.s32.totalorder %s824_s17, 0  ;;  %s38_s4 = ssub.s32 %s820_s16, %s1073_s26 }
  0x22   : > { %p595_p9 = scmp.lt.s32.totalorder %s824_s17, 2  ;;  %p41_p10 = scmp.eq.s32.totalorder %s38_s4, 0 }
  0x23   : > { %p52_p13 = por %p51_p6, %p50_p2  ;;  %p1060_p0 = scmp.eq.s32.totalorder %s887_s18, 1 }
  0x24   : > { %s170_s6 = sand.u32 1, %s812_s14   ;;  %s548_s9 = sshll.u32 %s820_s16, 8 }
  0x25   : > { %p938_p3 = por %p1060_p0, %p50_p2  ;;  %s532_s8 = sshll.u32 %s170_s6, 3 }
  0x26   : > { %s944_s7 = scalar_select %p41_p10, %s812_s14, %s43_s27  }
  0x27   : > { %s1062_s0 = sld [smem:[#allocation15_spill]]  ;;  %s174_s23 = scalar_lea.vmem [#allocation4], %s532_s8 }
  0x28   : > { %s183_s24 = sshll.u32 %s174_s23, 4  ;;  %p950_p11 = pnand %p595_p9, %p52_p13  ;;  %s184_s24 = int_to_ptr.vmem [resolvable:$true] %s183_s24 }
  0x29   : > { %s1064_s1 = sld [smem:[#allocation16_spill]]  ;;  %s190_s30 = sand.u32 1, %s824_s17  }
  0x2a   : > { %s171_s4 = scalar_lea.sflag [#allocation5], %s170_s6  ;;  %p681_p12 = pneg %p950_p11 }
  0x2b   : > { %s692_s10 = scalar_lea.vmem %s184_s24, 128  ;;  %s827_s11 = smov [#allocation4]  }
  0x2c   : > { %p693_p5 = scmp.ne.s32.totalorder %s184_s24, %s692_s10  ;;  %s697_s23 = sshll.u32 %s827_s11, 4  ;;  %s698_s23 = int_to_ptr.vmem [resolvable:$false] %s697_s23 }
  0x2d   : > { %s181_s19 = scalar_lea.hbm %s1062_s0, %s548_s9  ;;  %s699_s0 = scalar_lea.vmem %s698_s23, 256 }
  0x2e   : > { %p695_p7 = pnand %p693_p5, %p681_p12  ;;  %p700_p6 = scmp.lt.s32.totalorder %s184_s24, %s698_s23 }
  0x2f   : > { %s957_s27 = scalar_lea.hbm %s1064_s1, %s548_s9  ;;  %p701_p9 = scmp.lt.s32.totalorder %s699_s0, %s692_s10 }
  0x30   : > { %p696_p2 = pneg %p695_p7 }
  0x31   : > { %p702_p10 = por %p701_p9, %p700_p6 }
  0x33   : > { %p703_p13 = pnand %p702_p10, %p696_p2 }
  0x35   : > { %706 = shalt.err (!%p703_p13)
}
  0x36   : > { %586 = dma.hbm_to_vmem [thread:$0]  (!%p950_p11), %s181_s19, 128, %s184_s24, %s171_s4  }
  0x37   : > { %s452_s6 = scalar_lea.hbm %s957_s27, 128  ;;  %s194_s9 = scalar_lea.vmem [#allocation7], %s532_s8 }
  0x38   : > { %s204_s28 = sshll.u32 %s194_s9, 4  ;;  %s191_s29 = scalar_lea.sflag [#allocation8], %s190_s30  ;;  %s205_s28 = int_to_ptr.vmem [resolvable:$true] %s204_s28 }
  0x39   : > { %s720_s1 = scalar_lea.vmem %s205_s28, 128  ;;  %s828_s0 = smov [#allocation7]  }
  0x3a   : > { %p721_p0 = scmp.ne.s32.totalorder %s205_s28, %s720_s1  ;;  %s725_s10 = sshll.u32 %s828_s0, 4  ;;  %s726_s10 = int_to_ptr.vmem [resolvable:$false] %s725_s10 }
  0x3b   : > { %s727_s11 = scalar_lea.vmem %s726_s10, 256  ;;  %p728_p2 = scmp.lt.s32.totalorder %s205_s28, %s726_s10 }
  0x3c   : > { %p723_p5 = pnand %p721_p0, %p681_p12  ;;  %p729_p6 = scmp.lt.s32.totalorder %s727_s11, %s720_s1 }
  0x3e   : > { %p724_p7 = pneg %p723_p5  ;;  %p730_p9 = por %p729_p6, %p728_p2 }
  0x40   : > { %p731_p10 = pnand %p730_p9, %p724_p7 }
  0x42   : > { %734 = shalt.err (!%p731_p10)
}
  0x43   : > { %589 = dma.hbm_to_vmem [thread:$0]  (!%p950_p11), %s452_s6, 128, %s205_s28, %s191_s29  }
  0x44   : > { %213 = sbr.rel (%p906_p8) target bundleno = 419 (0x1a3), region = 32  ;;  %s976_s8 = sand.u32 (!%p906_p8), 1, %s808_s13  }
  0x45   : > { %s979_s19 = sshll.u32 (!%p906_p8), %s976_s8, 3  ;;  %s216_s24 = scalar_lea.sflag (!%p906_p8), [#allocation5], %s976_s8 }
  0x46   : > { %s219_s1 = scalar_lea.vmem (!%p906_p8), [#allocation4], %s979_s19 }
  0x49   : > { %787 = dma.done.wait (%p896_p4), %s216_s24, 128  }
  0x4a   : > { %789 = vsyncadd (%p896_p4), %s216_s24, 4294967168  ;;  %s224_s22 = sand.u32 1, %s887_s18   ;;  %s228_s27 = scalar_lea.vmem [#allocation7], %s979_s19 }
  0x4b   : > { %s225_s25 = scalar_lea.sflag [#allocation8], %s224_s22 }
  0x4c   : > { %791 = dma.done.wait (%p896_p4), %s225_s25, 128  }
  0x4d   : > { %793 = vsyncadd (%p896_p4), %s225_s25, 4294967168 }
  0x4e   : > { %795 = dma.done.wait (%p57_p1), [#allocation8], 128  }
  0x4f   : > { %797 = vsyncadd (%p57_p1), [#allocation8], 4294967168  ;;  %v829_v0 = vmov 0.0   ;;  %v261_v1 = vld [vmem:[%s219_s1] sm:$0xff]  ;;  %s830_s30 = smov 125   ;;  %s831_s4 = smov 124  }
  0x50   : > { %556 = vmatprep.subr.mxu0 %v829_v0  ;;  %295 = vrot.lane.b32.xlu1 %v261_v1, %s830_s30  ;;  %v263_v2 = vld [vmem:[%s228_s27] sm:$0xff]  ;;  %vm832_vm0 = vmmov 0   ;;  %s833_s20 = smov 126   ;;  %s834_s23 = smov 127   ;;  %vm311_vm1 = vcmask 1014784   ;;  %vm299_vm2 = vcmask 1022976  }
  0x51   : > { %307 = vrot.lane.b32.xlu0 %v261_v1, %s831_s4  ;;  %566 = vmatprep.mubr.msk.f32.mxu0 %vm832_vm0, %v829_v0  ;;  %vm287_vm3 = vcmask 1031168   ;;  %vm275_vm4 = vcmask 1039360   ;;  %v315_v15 = vld [vmem:[#allocation9] sm:$0xff]  ;;  %vm321_vm5 = vcmask 326656   ;;  %s259_s18 = scalar_lea.vmem [#allocation10], %s979_s19  ;;  %s545_s9 = sshll.u32 %s816_s15, 7 }
  0x52   : > { %s411_s6 = sshll.u32 %s259_s18, 4  ;;  %s1004_s0 = scalar_lea.hbm %s1053_s3, %s545_s9  ;;  %s999_s6 = int_to_ptr.vmem [resolvable:$true] %s411_s6 }
  0x53   : > { %s397_s10 = scalar_lea.sflag [#allocation6], %s976_s8  ;;  %s736_s11 = scalar_lea.vmem %s999_s6, 128 }
  0x54   : > { %297 = vrot.lane.b32.xlu1 %v263_v2, %s830_s30  ;;  %p737_p1 = scmp.ne.s32.totalorder %s999_s6, %s736_s11  ;;  %s835_s15 = smov [#allocation10]  }
  0x55   : > { %309 = vrot.lane.b32.xlu0 %v263_v2, %s831_s4  ;;  %s740_s19 = sshll.u32 %s835_s15, 4  ;;  %s741_s19 = int_to_ptr.vmem [resolvable:$false] %s740_s19 }
  0x56   : > { %p738_p4 = pnand %p737_p1, %p938_p3  ;;  %s742_s24 = scalar_lea.vmem %s741_s19, 256 }
  0x57   : > { %p743_p11 = scmp.lt.s32.totalorder %s999_s6, %s741_s19  ;;  %p744_p12 = scmp.lt.s32.totalorder %s742_s24, %s736_s11 }
  0x58   : > { %285 = vrot.lane.b32.xlu1 %v263_v2, %s833_s20  ;;  %p739_p8 = pneg %p738_p4 }
  0x59   : > { %283 = vrot.lane.b32.xlu0 %v261_v1, %s833_s20  ;;  %p745_p13 = por %p744_p12, %p743_p11 }
  0x5b   : > { %p746_p0 = pnand %p745_p13, %p739_p8 }
  0x5c   : > { %273 = vrot.lane.b32.xlu1 %v263_v2, %s834_s23 }
  0x5d   : > { %271 = vrot.lane.b32.xlu0 %v261_v1, %s834_s23 }
  0xc2   : > { %v296_v3 = vpop.permute.xlu1 %295 }
  0xc3   : > { %v308_v4 = vpop.permute.xlu0 %307 }
  0xc6   : > { %v298_v5 = vpop.permute.xlu1 %297 }
  0xc7   : > { %v310_v6 = vpop.permute.xlu0 %309  ;;  %v300_v8 = vsel %vm299_vm2, %v296_v3, %v298_v5 }
  0xc8   : > { %v312_v7 = vsel %vm311_vm1, %v308_v4, %v310_v6 }
  0xc9   : > { %557 = vmatpush3.msra.mxu0 %v312_v7 }
  0xca   : > { %558 = vmatprep.subr.mxu0 %v829_v0  ;;  %v286_v9 = vpop.permute.xlu1 %285 }
  0xcb   : > { %559 = vmatpush3.msra.mxu0 %v300_v8  ;;  %v284_v10 = vpop.permute.xlu0 %283 }
  0xcc   : > { %560 = vmatprep.subr.mxu0 %v829_v0  ;;  %v288_v11 = vsel %vm287_vm3, %v284_v10, %v286_v9 }
  0xcd   : > { %561 = vmatpush3.msra.mxu0 %v288_v11 }
  0xce   : > { %562 = vmatprep.subr.mxu0 %v829_v0  ;;  %v274_v12 = vpop.permute.xlu1 %273 }
  0xcf   : > { %v272_v13 = vpop.permute.xlu0 %271 }
  0xd0   : > { %v276_v14 = vsel %vm275_vm4, %v272_v13, %v274_v12 }
  0xd1   : > { %563 = vmatpush3.msra.mxu0 %v276_v14 }
  0xd2   : > { %564 = vmatprep.subr.mxu0 %v829_v0 }
  0xd3   : > { %565 = vmatpush3.msra.mxu0 %v261_v1 }
  0xd4   : > { %567 = vmatmul.mubr.msk.f32.vlgmr.msra.gmra.mxu0 %vm321_vm5, %v315_v15 }
 0x194   : > { %v391_v16 = vpop.f32.mrf.mxu0 }
 0x195   : > { %395 = vst [vmem:[%s259_s18] sm:$0xff] %v391_v16 }
 0x196   : > { %v568_v17 = vpop.f32.mrf.mxu0 }
 0x197   : > { %749 = shalt.err (!%p746_p0)
}
 0x198   : > { %s750_s1 = scalar_lea.hbm %s1004_s0, 128  ;;  %s754_s25 = scalar_lea.hbm %s1053_s3, 256 }
 0x199   : > { %p751_p5 = scmp.ne.s32.totalorder %s1004_s0, %s750_s1  ;;  %p755_p6 = scmp.lt.s32.totalorder %s1004_s0, %s1053_s3 }
 0x19a   : > { %p756_p9 = scmp.lt.s32.totalorder %s754_s25, %s750_s1 }
 0x19b   : > { %p752_p7 = pnand %p751_p5, %p938_p3 }
 0x19c   : > { %p757_p10 = por %p756_p9, %p755_p6 }
 0x19d   : > { %p753_p2 = pneg %p752_p7 }
 0x19f   : > { %p758_p1 = pnand %p757_p10, %p753_p2 }
 0x1a1   : > { %761 = shalt.err (!%p758_p1)
}
 0x1a2   : > { %577 = dma.vmem_to_hbm [thread:$0]  (%p938_p3), %s999_s6, 128, %s1004_s0, %s397_s10  }
 0x1a3 PF: > { %s423_s4 = sand.u32 1, %s804_s12   ;;  %p1065_p4 = scmp.ne.s32.totalorder %s1057_s21, 0 }
 0x1a4   : > { %p1066_p8 = scmp.ge.s32.totalorder %s824_s17, 2  ;;  %s424_s20 = scalar_lea.sflag [#allocation6], %s423_s4 }
 0x1a6   : > { %p591_p11 = pnand %p1066_p8, %p1065_p4 }
 0x1a8   : > { %p592_p12 = pneg %p591_p11 }
 0x1aa   : > { %799 = dma.done.wait (%p592_p12), %s424_s20, 128  }
 0x1ab   : > { %801 = vsyncadd (%p592_p12), %s424_s20, 4294967168  ;;  %s22_s17 = sadd.s32 1, %s824_s17   ;;  %s1067_s12 = smov %s808_s13 }
 0x1ac   : > { %p19_p13 = scmp.ge.s32.totalorder %s22_s17, 4   ;;  %s1068_s13 = smov %s812_s14 }
 0x1ad   : > { %s1069_s14 = smov %s944_s7  ;;  %s1070_s15 = smov %s820_s16 }
 0x1ae   : > { %s1071_s16 = smov %s1073_s26  ;;  %21 = sbr.rel (!%p19_p13) target bundleno = 11 (0xb), region = 94 }
 0x1b3   :  { %429 = vsyncpa [#allocation5], 1 }
 0x1b4   :  { %431 = vsyncpa [#allocation5 + $0x1], 1 }
 0x1b5   :  { %432 = vsyncpa [#allocation8], 1 }
 0x1b6   :  { %434 = vsyncpa [#allocation8 + $0x1], 1 }
 0x1b7   :  { %435 = vsyncpa [#allocation6], 1 }
 0x1b8   :  { %437 = vsyncpa [#allocation6 + $0x1], 1 }

</bundles_post_ra>
